<compile_context>
chip_gen: v7x
topology: tpu7x:2x2x1
jax: 0.10.0
libtpu: 0.0.40
codegen_flags: <defaults>
</compile_context>

<pallas_src>
import jax
import jax.numpy as jnp
from jax import lax
from jax.experimental import pallas as pl
from jax.experimental.pallas import tpu as pltpu

# ---- model dims (small, consistent with the module) ------------------------
SEQ_LEN = 8          # T
BATCH = 2            # B (per document)
INPUT_SIZE = 32      # I  (pre-embedded token features)
HIDDEN_SIZE = 32     # H
NUM_DIRECTIONS = 1   # unidirectional GRU encoder
ROWS = 8             # fused + padded batch rows per timestep (full sublane tile)


def pair_encoder_kernel(doc_ref,
                        wih_r_ref, wih_z_ref, wih_n_ref,
                        whh_r_ref, whh_z_ref, whh_n_ref,
                        b_r_ref, b_z_ref, b_n_ref, bhh_n_ref,
                        score_ref):
    # Hoisted, per-gate input projections (off the serial chain).  Each result
    # is (T*ROWS, H) and lane-aligned at offset 0.
    doc = doc_ref[...]                                               # (T*8, I)
    gi_r = (jnp.dot(doc, wih_r_ref[...], preferred_element_type=jnp.float32)
            + b_r_ref[...])
    gi_z = (jnp.dot(doc, wih_z_ref[...], preferred_element_type=jnp.float32)
            + b_z_ref[...])
    gi_n = (jnp.dot(doc, wih_n_ref[...], preferred_element_type=jnp.float32)
            + b_n_ref[...])

    whh_r = whh_r_ref[...]                                           # (H, H)
    whh_z = whh_z_ref[...]                                           # (H, H)
    whh_n = whh_n_ref[...]                                           # (H, H)
    bhh_n = bhh_n_ref[...]                                           # (8, H) pre-broadcast

    # ---- t = 0 peeled: h0 == 0, so gh_* == 0 (bit-exact) -------------------
    r = jax.nn.sigmoid(gi_r[0:ROWS, :])
    z = jax.nn.sigmoid(gi_z[0:ROWS, :])
    n = jnp.tanh(gi_n[0:ROWS, :] + r * bhh_n)
    h = (1.0 - z) * n                                                # (8, H)

    # ---- t = 1 .. T-1, statically unrolled ----------------------------------
    # All operands are (8, H) at lane offset 0 -> no rotates/relayouts on the
    # dependent chain; the three recurrent matmuls overlap in the MXU pipeline.
    for t in range(1, SEQ_LEN):
        lo = t * ROWS
        hi = lo + ROWS
        gh_r = jnp.dot(h, whh_r, preferred_element_type=jnp.float32)
        gh_z = jnp.dot(h, whh_z, preferred_element_type=jnp.float32)
        gh_n = jnp.dot(h, whh_n, preferred_element_type=jnp.float32) + bhh_n
        r = jax.nn.sigmoid(gi_r[lo:hi, :] + gh_r)
        z = jax.nn.sigmoid(gi_z[lo:hi, :] + gh_z)
        n = jnp.tanh(gi_n[lo:hi, :] + r * gh_n)
        h = (1.0 - z) * n + z * h

    # Row 0 = doc_a batch-0 last hidden, row 2 = doc_b batch-0 last hidden.
    # torch.bmm(a.view(-1,1,D), b.view(-1,D,1))[0,:,:] == <h_a[0], h_b[0]>  (1,1)
    score_ref[...] = jnp.sum(h[0:1, :] * h[2:3, :], axis=-1, keepdims=True)


def prepare_params(params):
    """Init-time (loop-invariant) parameter prep: split per gate, fold biases.

    torch.nn.GRU gate order is [r, z, n]:
      r = sigmoid(x Wir + bir + h Whr + bhr)
      z = sigmoid(x Wiz + biz + h Whz + bhz)
      n = tanh   (x Win + bin + r * (h Whn + bhn))
    So bih+bhh fold for r/z; the n-gate recurrent bias stays inside r*(.).
    """
    wih, whh, bih, bhh = params
    H = HIDDEN_SIZE
    wih_r, wih_z, wih_n = wih[:, :H], wih[:, H:2 * H], wih[:, 2 * H:]
    whh_r, whh_z, whh_n = whh[:, :H], whh[:, H:2 * H], whh[:, 2 * H:]
    b_r = bih[:, :H] + bhh[:, :H]                                    # (1, H)
    b_z = bih[:, H:2 * H] + bhh[:, H:2 * H]                          # (1, H)
    b_n = bih[:, 2 * H:]                                             # (1, H)
    bhh_n = jnp.broadcast_to(bhh[:, 2 * H:], (ROWS, H))              # (8, H)
    return (wih_r, wih_z, wih_n, whh_r, whh_z, whh_n, b_r, b_z, b_n, bhh_n)


@jax.jit
def pair_encoder(doc_a, doc_b, kparams):
    """doc_a, doc_b: (T, B, I) float32.  kparams: prepare_params(...) output.

    Returns the similarity score of shape (1, 1).
    """
    # Fuse the two documents along the batch axis and pad to 8 sublanes so the
    # per-step row slices in the kernel are full, tile-aligned (8, H) blocks.
    doc = jnp.concatenate([doc_a, doc_b], axis=1)                    # (T, 2B, I)
    doc = jnp.pad(doc, ((0, 0), (0, ROWS - 2 * BATCH), (0, 0)))      # (T, 8, I)
    doc2d = doc.reshape(SEQ_LEN * ROWS, INPUT_SIZE)                  # (T*8, I)

    vmem_spec = pl.BlockSpec(memory_space=pltpu.MemorySpace.VMEM)
    return pl.pallas_call(
        pair_encoder_kernel,
        out_shape=jax.ShapeDtypeStruct((1, 1), jnp.float32),
        in_specs=[vmem_spec] * 11,
        out_specs=vmem_spec,
    )(doc2d, *kparams)


# ---- pure-JAX reference (same semantics) for a correctness check ------------
def _ref_gru_last_hidden(doc, wih, whh, bih, bhh):
    H = HIDDEN_SIZE

    def step(h, x_t):
        gi = x_t @ wih + bih
        gh = h @ whh + bhh
        r = jax.nn.sigmoid(gi[:, :H] + gh[:, :H])
        z = jax.nn.sigmoid(gi[:, H:2 * H] + gh[:, H:2 * H])
        n = jnp.tanh(gi[:, 2 * H:] + r * gh[:, 2 * H:])
        h_new = (1.0 - z) * n + z * h
        return h_new, None

    h0 = jnp.zeros((doc.shape[1], H), jnp.float32)
    h_T, _ = lax.scan(step, h0, doc)
    return h_T


def _ref_pair_encoder(doc_a, doc_b, params):
    wih, whh, bih, bhh = params
    h_a = _ref_gru_last_hidden(doc_a, wih, whh, bih, bhh)
    h_b = _ref_gru_last_hidden(doc_b, wih, whh, bih, bhh)
    return jnp.sum(h_a[0:1] * h_b[0:1], axis=-1, keepdims=True)


def init_params(key):
    """Deterministic GRU params, torch-style U(-1/sqrt(H), 1/sqrt(H)) init."""
    bound = 1.0 / jnp.sqrt(jnp.float32(HIDDEN_SIZE))
    k1, k2, k3, k4 = jax.random.split(key, 4)
    wih = jax.random.uniform(k1, (INPUT_SIZE, 3 * HIDDEN_SIZE), jnp.float32, -bound, bound)
    whh = jax.random.uniform(k2, (HIDDEN_SIZE, 3 * HIDDEN_SIZE), jnp.float32, -bound, bound)
    bih = jax.random.uniform(k3, (1, 3 * HIDDEN_SIZE), jnp.float32, -bound, bound)
    bhh = jax.random.uniform(k4, (1, 3 * HIDDEN_SIZE), jnp.float32, -bound, bound)
    return wih, whh, bih, bhh


if __name__ == "__main__":
    key = jax.random.PRNGKey(0)
    k_p, k_a, k_b = jax.random.split(key, 3)
    params = init_params(k_p)
    doc_a = jax.random.normal(k_a, (SEQ_LEN, BATCH, INPUT_SIZE), jnp.float32)
    doc_b = jax.random.normal(k_b, (SEQ_LEN, BATCH, INPUT_SIZE), jnp.float32)

    # Loop-invariant parameter prep happens once, off the per-call path.
    kparams = prepare_params(params)

    score = jax.block_until_ready(pair_encoder(doc_a, doc_b, kparams))
    ref = jax.block_until_ready(_ref_pair_encoder(doc_a, doc_b, params))

    assert score.shape == (1, 1), score.shape
    assert jnp.allclose(score, ref, atol=1e-5, rtol=1e-5), (score, ref)
    print("KERNEL_OK")
</pallas_src>

<mosaic_0001>
module attributes {stable_mosaic.version = 11 : i64} {
  func.func @pair_encoder_kernel(%arg0: memref<64x32xf32, #tpu.memory_space<vmem>>, %arg1: memref<32x32xf32, #tpu.memory_space<vmem>>, %arg2: memref<32x32xf32, #tpu.memory_space<vmem>>, %arg3: memref<32x32xf32, #tpu.memory_space<vmem>>, %arg4: memref<32x32xf32, #tpu.memory_space<vmem>>, %arg5: memref<32x32xf32, #tpu.memory_space<vmem>>, %arg6: memref<32x32xf32, #tpu.memory_space<vmem>>, %arg7: memref<1x32xf32, #tpu.memory_space<vmem>>, %arg8: memref<1x32xf32, #tpu.memory_space<vmem>>, %arg9: memref<1x32xf32, #tpu.memory_space<vmem>>, %arg10: memref<8x32xf32, #tpu.memory_space<vmem>>, %arg11: memref<1x1xf32, #tpu.memory_space<vmem>>) attributes {dimension_semantics = [], scalar_prefetch = 0 : i64, scratch_operands = 0 : i64, tpu.core_type = #tpu.core_type<tc>} {
    %c0 = arith.constant 0 : index
    %c0_0 = arith.constant 0 : index
    %0 = vector.load %arg0[%c0, %c0_0] : memref<64x32xf32, #tpu.memory_space<vmem>>, vector<64x32xf32>
    %c0_1 = arith.constant 0 : index
    %c0_2 = arith.constant 0 : index
    %1 = vector.load %arg1[%c0_1, %c0_2] : memref<32x32xf32, #tpu.memory_space<vmem>>, vector<32x32xf32>
    %cst = arith.constant dense<0.000000e+00> : vector<64x32xf32>
    %2 = tpu.matmul %0, %1, %cst {dimension_numbers = #tpu.dot_dimension_numbers<[1], [0], [0], [1], [0, 0, 1, 1], [], []>} : vector<64x32xf32>, vector<32x32xf32>, vector<64x32xf32> -> vector<64x32xf32>
    %c0_3 = arith.constant 0 : index
    %c0_4 = arith.constant 0 : index
    %3 = vector.load %arg7[%c0_3, %c0_4] : memref<1x32xf32, #tpu.memory_space<vmem>>, vector<1x32xf32>
    %4 = vector.broadcast %3 : vector<1x32xf32> to vector<64x32xf32>
    %5 = arith.addf %2, %4 : vector<64x32xf32>
    %c0_5 = arith.constant 0 : index
    %c0_6 = arith.constant 0 : index
    %6 = vector.load %arg2[%c0_5, %c0_6] : memref<32x32xf32, #tpu.memory_space<vmem>>, vector<32x32xf32>
    %cst_7 = arith.constant dense<0.000000e+00> : vector<64x32xf32>
    %7 = tpu.matmul %0, %6, %cst_7 {dimension_numbers = #tpu.dot_dimension_numbers<[1], [0], [0], [1], [0, 0, 1, 1], [], []>} : vector<64x32xf32>, vector<32x32xf32>, vector<64x32xf32> -> vector<64x32xf32>
    %c0_8 = arith.constant 0 : index
    %c0_9 = arith.constant 0 : index
    %8 = vector.load %arg8[%c0_8, %c0_9] : memref<1x32xf32, #tpu.memory_space<vmem>>, vector<1x32xf32>
    %9 = vector.broadcast %8 : vector<1x32xf32> to vector<64x32xf32>
    %10 = arith.addf %7, %9 : vector<64x32xf32>
    %c0_10 = arith.constant 0 : index
    %c0_11 = arith.constant 0 : index
    %11 = vector.load %arg3[%c0_10, %c0_11] : memref<32x32xf32, #tpu.memory_space<vmem>>, vector<32x32xf32>
    %cst_12 = arith.constant dense<0.000000e+00> : vector<64x32xf32>
    %12 = tpu.matmul %0, %11, %cst_12 {dimension_numbers = #tpu.dot_dimension_numbers<[1], [0], [0], [1], [0, 0, 1, 1], [], []>} : vector<64x32xf32>, vector<32x32xf32>, vector<64x32xf32> -> vector<64x32xf32>
    %c0_13 = arith.constant 0 : index
    %c0_14 = arith.constant 0 : index
    %13 = vector.load %arg9[%c0_13, %c0_14] : memref<1x32xf32, #tpu.memory_space<vmem>>, vector<1x32xf32>
    %14 = vector.broadcast %13 : vector<1x32xf32> to vector<64x32xf32>
    %15 = arith.addf %12, %14 : vector<64x32xf32>
    %c0_15 = arith.constant 0 : index
    %c0_16 = arith.constant 0 : index
    %16 = vector.load %arg4[%c0_15, %c0_16] : memref<32x32xf32, #tpu.memory_space<vmem>>, vector<32x32xf32>
    %c0_17 = arith.constant 0 : index
    %c0_18 = arith.constant 0 : index
    %17 = vector.load %arg5[%c0_17, %c0_18] : memref<32x32xf32, #tpu.memory_space<vmem>>, vector<32x32xf32>
    %c0_19 = arith.constant 0 : index
    %c0_20 = arith.constant 0 : index
    %18 = vector.load %arg6[%c0_19, %c0_20] : memref<32x32xf32, #tpu.memory_space<vmem>>, vector<32x32xf32>
    %c0_21 = arith.constant 0 : index
    %c0_22 = arith.constant 0 : index
    %19 = vector.load %arg10[%c0_21, %c0_22] : memref<8x32xf32, #tpu.memory_space<vmem>>, vector<8x32xf32>
    %20 = vector.extract_strided_slice %5 {offsets = [0, 0], sizes = [8, 32], strides = [1, 1]} : vector<64x32xf32> to vector<8x32xf32>
    %21 = arith.negf %20 : vector<8x32xf32>
    %22 = math.exp %21 : vector<8x32xf32>
    %cst_23 = arith.constant 1.000000e+00 : f32
    %23 = vector.broadcast %cst_23 : f32 to vector<8x32xf32>
    %24 = arith.addf %23, %22 : vector<8x32xf32>
    %25 = arith.divf %23, %24 : vector<8x32xf32>
    %26 = vector.extract_strided_slice %10 {offsets = [0, 0], sizes = [8, 32], strides = [1, 1]} : vector<64x32xf32> to vector<8x32xf32>
    %27 = arith.negf %26 : vector<8x32xf32>
    %28 = math.exp %27 : vector<8x32xf32>
    %cst_24 = arith.constant 1.000000e+00 : f32
    %29 = vector.broadcast %cst_24 : f32 to vector<8x32xf32>
    %30 = arith.addf %29, %28 : vector<8x32xf32>
    %31 = arith.divf %29, %30 : vector<8x32xf32>
    %32 = vector.extract_strided_slice %15 {offsets = [0, 0], sizes = [8, 32], strides = [1, 1]} : vector<64x32xf32> to vector<8x32xf32>
    %33 = arith.mulf %25, %19 : vector<8x32xf32>
    %34 = arith.addf %32, %33 : vector<8x32xf32>
    %35 = math.tanh %34 : vector<8x32xf32>
    %cst_25 = arith.constant 1.000000e+00 : f32
    %36 = vector.broadcast %cst_25 : f32 to vector<8x32xf32>
    %37 = arith.subf %36, %31 : vector<8x32xf32>
    %38 = arith.mulf %37, %35 : vector<8x32xf32>
    %cst_26 = arith.constant dense<0.000000e+00> : vector<8x32xf32>
    %39 = tpu.matmul %38, %16, %cst_26 {dimension_numbers = #tpu.dot_dimension_numbers<[1], [0], [0], [1], [0, 0, 1, 1], [], []>} : vector<8x32xf32>, vector<32x32xf32>, vector<8x32xf32> -> vector<8x32xf32>
    %cst_27 = arith.constant dense<0.000000e+00> : vector<8x32xf32>
    %40 = tpu.matmul %38, %17, %cst_27 {dimension_numbers = #tpu.dot_dimension_numbers<[1], [0], [0], [1], [0, 0, 1, 1], [], []>} : vector<8x32xf32>, vector<32x32xf32>, vector<8x32xf32> -> vector<8x32xf32>
    %cst_28 = arith.constant dense<0.000000e+00> : vector<8x32xf32>
    %41 = tpu.matmul %38, %18, %cst_28 {dimension_numbers = #tpu.dot_dimension_numbers<[1], [0], [0], [1], [0, 0, 1, 1], [], []>} : vector<8x32xf32>, vector<32x32xf32>, vector<8x32xf32> -> vector<8x32xf32>
    %42 = arith.addf %41, %19 : vector<8x32xf32>
    %43 = vector.extract_strided_slice %5 {offsets = [8, 0], sizes = [8, 32], strides = [1, 1]} : vector<64x32xf32> to vector<8x32xf32>
    %44 = arith.addf %43, %39 : vector<8x32xf32>
    %45 = arith.negf %44 : vector<8x32xf32>
    %46 = math.exp %45 : vector<8x32xf32>
    %cst_29 = arith.constant 1.000000e+00 : f32
    %47 = vector.broadcast %cst_29 : f32 to vector<8x32xf32>
    %48 = arith.addf %47, %46 : vector<8x32xf32>
    %49 = arith.divf %47, %48 : vector<8x32xf32>
    %50 = vector.extract_strided_slice %10 {offsets = [8, 0], sizes = [8, 32], strides = [1, 1]} : vector<64x32xf32> to vector<8x32xf32>
    %51 = arith.addf %50, %40 : vector<8x32xf32>
    %52 = arith.negf %51 : vector<8x32xf32>
    %53 = math.exp %52 : vector<8x32xf32>
    %cst_30 = arith.constant 1.000000e+00 : f32
    %54 = vector.broadcast %cst_30 : f32 to vector<8x32xf32>
    %55 = arith.addf %54, %53 : vector<8x32xf32>
    %56 = arith.divf %54, %55 : vector<8x32xf32>
    %57 = vector.extract_strided_slice %15 {offsets = [8, 0], sizes = [8, 32], strides = [1, 1]} : vector<64x32xf32> to vector<8x32xf32>
    %58 = arith.mulf %49, %42 : vector<8x32xf32>
    %59 = arith.addf %57, %58 : vector<8x32xf32>
    %60 = math.tanh %59 : vector<8x32xf32>
    %cst_31 = arith.constant 1.000000e+00 : f32
    %61 = vector.broadcast %cst_31 : f32 to vector<8x32xf32>
    %62 = arith.subf %61, %56 : vector<8x32xf32>
    %63 = arith.mulf %62, %60 : vector<8x32xf32>
    %64 = arith.mulf %56, %38 : vector<8x32xf32>
    %65 = arith.addf %63, %64 : vector<8x32xf32>
    %cst_32 = arith.constant dense<0.000000e+00> : vector<8x32xf32>
    %66 = tpu.matmul %65, %16, %cst_32 {dimension_numbers = #tpu.dot_dimension_numbers<[1], [0], [0], [1], [0, 0, 1, 1], [], []>} : vector<8x32xf32>, vector<32x32xf32>, vector<8x32xf32> -> vector<8x32xf32>
    %cst_33 = arith.constant dense<0.000000e+00> : vector<8x32xf32>
    %67 = tpu.matmul %65, %17, %cst_33 {dimension_numbers = #tpu.dot_dimension_numbers<[1], [0], [0], [1], [0, 0, 1, 1], [], []>} : vector<8x32xf32>, vector<32x32xf32>, vector<8x32xf32> -> vector<8x32xf32>
    %cst_34 = arith.constant dense<0.000000e+00> : vector<8x32xf32>
    %68 = tpu.matmul %65, %18, %cst_34 {dimension_numbers = #tpu.dot_dimension_numbers<[1], [0], [0], [1], [0, 0, 1, 1], [], []>} : vector<8x32xf32>, vector<32x32xf32>, vector<8x32xf32> -> vector<8x32xf32>
    %69 = arith.addf %68, %19 : vector<8x32xf32>
    %70 = vector.extract_strided_slice %5 {offsets = [16, 0], sizes = [8, 32], strides = [1, 1]} : vector<64x32xf32> to vector<8x32xf32>
    %71 = arith.addf %70, %66 : vector<8x32xf32>
    %72 = arith.negf %71 : vector<8x32xf32>
    %73 = math.exp %72 : vector<8x32xf32>
    %cst_35 = arith.constant 1.000000e+00 : f32
    %74 = vector.broadcast %cst_35 : f32 to vector<8x32xf32>
    %75 = arith.addf %74, %73 : vector<8x32xf32>
    %76 = arith.divf %74, %75 : vector<8x32xf32>
    %77 = vector.extract_strided_slice %10 {offsets = [16, 0], sizes = [8, 32], strides = [1, 1]} : vector<64x32xf32> to vector<8x32xf32>
    %78 = arith.addf %77, %67 : vector<8x32xf32>
    %79 = arith.negf %78 : vector<8x32xf32>
    %80 = math.exp %79 : vector<8x32xf32>
    %cst_36 = arith.constant 1.000000e+00 : f32
    %81 = vector.broadcast %cst_36 : f32 to vector<8x32xf32>
    %82 = arith.addf %81, %80 : vector<8x32xf32>
    %83 = arith.divf %81, %82 : vector<8x32xf32>
    %84 = vector.extract_strided_slice %15 {offsets = [16, 0], sizes = [8, 32], strides = [1, 1]} : vector<64x32xf32> to vector<8x32xf32>
    %85 = arith.mulf %76, %69 : vector<8x32xf32>
    %86 = arith.addf %84, %85 : vector<8x32xf32>
    %87 = math.tanh %86 : vector<8x32xf32>
    %cst_37 = arith.constant 1.000000e+00 : f32
    %88 = vector.broadcast %cst_37 : f32 to vector<8x32xf32>
    %89 = arith.subf %88, %83 : vector<8x32xf32>
    %90 = arith.mulf %89, %87 : vector<8x32xf32>
    %91 = arith.mulf %83, %65 : vector<8x32xf32>
    %92 = arith.addf %90, %91 : vector<8x32xf32>
    %cst_38 = arith.constant dense<0.000000e+00> : vector<8x32xf32>
    %93 = tpu.matmul %92, %16, %cst_38 {dimension_numbers = #tpu.dot_dimension_numbers<[1], [0], [0], [1], [0, 0, 1, 1], [], []>} : vector<8x32xf32>, vector<32x32xf32>, vector<8x32xf32> -> vector<8x32xf32>
    %cst_39 = arith.constant dense<0.000000e+00> : vector<8x32xf32>
    %94 = tpu.matmul %92, %17, %cst_39 {dimension_numbers = #tpu.dot_dimension_numbers<[1], [0], [0], [1], [0, 0, 1, 1], [], []>} : vector<8x32xf32>, vector<32x32xf32>, vector<8x32xf32> -> vector<8x32xf32>
    %cst_40 = arith.constant dense<0.000000e+00> : vector<8x32xf32>
    %95 = tpu.matmul %92, %18, %cst_40 {dimension_numbers = #tpu.dot_dimension_numbers<[1], [0], [0], [1], [0, 0, 1, 1], [], []>} : vector<8x32xf32>, vector<32x32xf32>, vector<8x32xf32> -> vector<8x32xf32>
    %96 = arith.addf %95, %19 : vector<8x32xf32>
    %97 = vector.extract_strided_slice %5 {offsets = [24, 0], sizes = [8, 32], strides = [1, 1]} : vector<64x32xf32> to vector<8x32xf32>
    %98 = arith.addf %97, %93 : vector<8x32xf32>
    %99 = arith.negf %98 : vector<8x32xf32>
    %100 = math.exp %99 : vector<8x32xf32>
    %cst_41 = arith.constant 1.000000e+00 : f32
    %101 = vector.broadcast %cst_41 : f32 to vector<8x32xf32>
    %102 = arith.addf %101, %100 : vector<8x32xf32>
    %103 = arith.divf %101, %102 : vector<8x32xf32>
    %104 = vector.extract_strided_slice %10 {offsets = [24, 0], sizes = [8, 32], strides = [1, 1]} : vector<64x32xf32> to vector<8x32xf32>
    %105 = arith.addf %104, %94 : vector<8x32xf32>
    %106 = arith.negf %105 : vector<8x32xf32>
    %107 = math.exp %106 : vector<8x32xf32>
    %cst_42 = arith.constant 1.000000e+00 : f32
    %108 = vector.broadcast %cst_42 : f32 to vector<8x32xf32>
    %109 = arith.addf %108, %107 : vector<8x32xf32>
    %110 = arith.divf %108, %109 : vector<8x32xf32>
    %111 = vector.extract_strided_slice %15 {offsets = [24, 0], sizes = [8, 32], strides = [1, 1]} : vector<64x32xf32> to vector<8x32xf32>
    %112 = arith.mulf %103, %96 : vector<8x32xf32>
    %113 = arith.addf %111, %112 : vector<8x32xf32>
    %114 = math.tanh %113 : vector<8x32xf32>
    %cst_43 = arith.constant 1.000000e+00 : f32
    %115 = vector.broadcast %cst_43 : f32 to vector<8x32xf32>
    %116 = arith.subf %115, %110 : vector<8x32xf32>
    %117 = arith.mulf %116, %114 : vector<8x32xf32>
    %118 = arith.mulf %110, %92 : vector<8x32xf32>
    %119 = arith.addf %117, %118 : vector<8x32xf32>
    %cst_44 = arith.constant dense<0.000000e+00> : vector<8x32xf32>
    %120 = tpu.matmul %119, %16, %cst_44 {dimension_numbers = #tpu.dot_dimension_numbers<[1], [0], [0], [1], [0, 0, 1, 1], [], []>} : vector<8x32xf32>, vector<32x32xf32>, vector<8x32xf32> -> vector<8x32xf32>
    %cst_45 = arith.constant dense<0.000000e+00> : vector<8x32xf32>
    %121 = tpu.matmul %119, %17, %cst_45 {dimension_numbers = #tpu.dot_dimension_numbers<[1], [0], [0], [1], [0, 0, 1, 1], [], []>} : vector<8x32xf32>, vector<32x32xf32>, vector<8x32xf32> -> vector<8x32xf32>
    %cst_46 = arith.constant dense<0.000000e+00> : vector<8x32xf32>
    %122 = tpu.matmul %119, %18, %cst_46 {dimension_numbers = #tpu.dot_dimension_numbers<[1], [0], [0], [1], [0, 0, 1, 1], [], []>} : vector<8x32xf32>, vector<32x32xf32>, vector<8x32xf32> -> vector<8x32xf32>
    %123 = arith.addf %122, %19 : vector<8x32xf32>
    %124 = vector.extract_strided_slice %5 {offsets = [32, 0], sizes = [8, 32], strides = [1, 1]} : vector<64x32xf32> to vector<8x32xf32>
    %125 = arith.addf %124, %120 : vector<8x32xf32>
    %126 = arith.negf %125 : vector<8x32xf32>
    %127 = math.exp %126 : vector<8x32xf32>
    %cst_47 = arith.constant 1.000000e+00 : f32
    %128 = vector.broadcast %cst_47 : f32 to vector<8x32xf32>
    %129 = arith.addf %128, %127 : vector<8x32xf32>
    %130 = arith.divf %128, %129 : vector<8x32xf32>
    %131 = vector.extract_strided_slice %10 {offsets = [32, 0], sizes = [8, 32], strides = [1, 1]} : vector<64x32xf32> to vector<8x32xf32>
    %132 = arith.addf %131, %121 : vector<8x32xf32>
    %133 = arith.negf %132 : vector<8x32xf32>
    %134 = math.exp %133 : vector<8x32xf32>
    %cst_48 = arith.constant 1.000000e+00 : f32
    %135 = vector.broadcast %cst_48 : f32 to vector<8x32xf32>
    %136 = arith.addf %135, %134 : vector<8x32xf32>
    %137 = arith.divf %135, %136 : vector<8x32xf32>
    %138 = vector.extract_strided_slice %15 {offsets = [32, 0], sizes = [8, 32], strides = [1, 1]} : vector<64x32xf32> to vector<8x32xf32>
    %139 = arith.mulf %130, %123 : vector<8x32xf32>
    %140 = arith.addf %138, %139 : vector<8x32xf32>
    %141 = math.tanh %140 : vector<8x32xf32>
    %cst_49 = arith.constant 1.000000e+00 : f32
    %142 = vector.broadcast %cst_49 : f32 to vector<8x32xf32>
    %143 = arith.subf %142, %137 : vector<8x32xf32>
    %144 = arith.mulf %143, %141 : vector<8x32xf32>
    %145 = arith.mulf %137, %119 : vector<8x32xf32>
    %146 = arith.addf %144, %145 : vector<8x32xf32>
    %cst_50 = arith.constant dense<0.000000e+00> : vector<8x32xf32>
    %147 = tpu.matmul %146, %16, %cst_50 {dimension_numbers = #tpu.dot_dimension_numbers<[1], [0], [0], [1], [0, 0, 1, 1], [], []>} : vector<8x32xf32>, vector<32x32xf32>, vector<8x32xf32> -> vector<8x32xf32>
    %cst_51 = arith.constant dense<0.000000e+00> : vector<8x32xf32>
    %148 = tpu.matmul %146, %17, %cst_51 {dimension_numbers = #tpu.dot_dimension_numbers<[1], [0], [0], [1], [0, 0, 1, 1], [], []>} : vector<8x32xf32>, vector<32x32xf32>, vector<8x32xf32> -> vector<8x32xf32>
    %cst_52 = arith.constant dense<0.000000e+00> : vector<8x32xf32>
    %149 = tpu.matmul %146, %18, %cst_52 {dimension_numbers = #tpu.dot_dimension_numbers<[1], [0], [0], [1], [0, 0, 1, 1], [], []>} : vector<8x32xf32>, vector<32x32xf32>, vector<8x32xf32> -> vector<8x32xf32>
    %150 = arith.addf %149, %19 : vector<8x32xf32>
    %151 = vector.extract_strided_slice %5 {offsets = [40, 0], sizes = [8, 32], strides = [1, 1]} : vector<64x32xf32> to vector<8x32xf32>
    %152 = arith.addf %151, %147 : vector<8x32xf32>
    %153 = arith.negf %152 : vector<8x32xf32>
    %154 = math.exp %153 : vector<8x32xf32>
    %cst_53 = arith.constant 1.000000e+00 : f32
    %155 = vector.broadcast %cst_53 : f32 to vector<8x32xf32>
    %156 = arith.addf %155, %154 : vector<8x32xf32>
    %157 = arith.divf %155, %156 : vector<8x32xf32>
    %158 = vector.extract_strided_slice %10 {offsets = [40, 0], sizes = [8, 32], strides = [1, 1]} : vector<64x32xf32> to vector<8x32xf32>
    %159 = arith.addf %158, %148 : vector<8x32xf32>
    %160 = arith.negf %159 : vector<8x32xf32>
    %161 = math.exp %160 : vector<8x32xf32>
    %cst_54 = arith.constant 1.000000e+00 : f32
    %162 = vector.broadcast %cst_54 : f32 to vector<8x32xf32>
    %163 = arith.addf %162, %161 : vector<8x32xf32>
    %164 = arith.divf %162, %163 : vector<8x32xf32>
    %165 = vector.extract_strided_slice %15 {offsets = [40, 0], sizes = [8, 32], strides = [1, 1]} : vector<64x32xf32> to vector<8x32xf32>
    %166 = arith.mulf %157, %150 : vector<8x32xf32>
    %167 = arith.addf %165, %166 : vector<8x32xf32>
    %168 = math.tanh %167 : vector<8x32xf32>
    %cst_55 = arith.constant 1.000000e+00 : f32
    %169 = vector.broadcast %cst_55 : f32 to vector<8x32xf32>
    %170 = arith.subf %169, %164 : vector<8x32xf32>
    %171 = arith.mulf %170, %168 : vector<8x32xf32>
    %172 = arith.mulf %164, %146 : vector<8x32xf32>
    %173 = arith.addf %171, %172 : vector<8x32xf32>
    %cst_56 = arith.constant dense<0.000000e+00> : vector<8x32xf32>
    %174 = tpu.matmul %173, %16, %cst_56 {dimension_numbers = #tpu.dot_dimension_numbers<[1], [0], [0], [1], [0, 0, 1, 1], [], []>} : vector<8x32xf32>, vector<32x32xf32>, vector<8x32xf32> -> vector<8x32xf32>
    %cst_57 = arith.constant dense<0.000000e+00> : vector<8x32xf32>
    %175 = tpu.matmul %173, %17, %cst_57 {dimension_numbers = #tpu.dot_dimension_numbers<[1], [0], [0], [1], [0, 0, 1, 1], [], []>} : vector<8x32xf32>, vector<32x32xf32>, vector<8x32xf32> -> vector<8x32xf32>
    %cst_58 = arith.constant dense<0.000000e+00> : vector<8x32xf32>
    %176 = tpu.matmul %173, %18, %cst_58 {dimension_numbers = #tpu.dot_dimension_numbers<[1], [0], [0], [1], [0, 0, 1, 1], [], []>} : vector<8x32xf32>, vector<32x32xf32>, vector<8x32xf32> -> vector<8x32xf32>
    %177 = arith.addf %176, %19 : vector<8x32xf32>
    %178 = vector.extract_strided_slice %5 {offsets = [48, 0], sizes = [8, 32], strides = [1, 1]} : vector<64x32xf32> to vector<8x32xf32>
    %179 = arith.addf %178, %174 : vector<8x32xf32>
    %180 = arith.negf %179 : vector<8x32xf32>
    %181 = math.exp %180 : vector<8x32xf32>
    %cst_59 = arith.constant 1.000000e+00 : f32
    %182 = vector.broadcast %cst_59 : f32 to vector<8x32xf32>
    %183 = arith.addf %182, %181 : vector<8x32xf32>
    %184 = arith.divf %182, %183 : vector<8x32xf32>
    %185 = vector.extract_strided_slice %10 {offsets = [48, 0], sizes = [8, 32], strides = [1, 1]} : vector<64x32xf32> to vector<8x32xf32>
    %186 = arith.addf %185, %175 : vector<8x32xf32>
    %187 = arith.negf %186 : vector<8x32xf32>
    %188 = math.exp %187 : vector<8x32xf32>
    %cst_60 = arith.constant 1.000000e+00 : f32
    %189 = vector.broadcast %cst_60 : f32 to vector<8x32xf32>
    %190 = arith.addf %189, %188 : vector<8x32xf32>
    %191 = arith.divf %189, %190 : vector<8x32xf32>
    %192 = vector.extract_strided_slice %15 {offsets = [48, 0], sizes = [8, 32], strides = [1, 1]} : vector<64x32xf32> to vector<8x32xf32>
    %193 = arith.mulf %184, %177 : vector<8x32xf32>
    %194 = arith.addf %192, %193 : vector<8x32xf32>
    %195 = math.tanh %194 : vector<8x32xf32>
    %cst_61 = arith.constant 1.000000e+00 : f32
    %196 = vector.broadcast %cst_61 : f32 to vector<8x32xf32>
    %197 = arith.subf %196, %191 : vector<8x32xf32>
    %198 = arith.mulf %197, %195 : vector<8x32xf32>
    %199 = arith.mulf %191, %173 : vector<8x32xf32>
    %200 = arith.addf %198, %199 : vector<8x32xf32>
    %cst_62 = arith.constant dense<0.000000e+00> : vector<8x32xf32>
    %201 = tpu.matmul %200, %16, %cst_62 {dimension_numbers = #tpu.dot_dimension_numbers<[1], [0], [0], [1], [0, 0, 1, 1], [], []>} : vector<8x32xf32>, vector<32x32xf32>, vector<8x32xf32> -> vector<8x32xf32>
    %cst_63 = arith.constant dense<0.000000e+00> : vector<8x32xf32>
    %202 = tpu.matmul %200, %17, %cst_63 {dimension_numbers = #tpu.dot_dimension_numbers<[1], [0], [0], [1], [0, 0, 1, 1], [], []>} : vector<8x32xf32>, vector<32x32xf32>, vector<8x32xf32> -> vector<8x32xf32>
    %cst_64 = arith.constant dense<0.000000e+00> : vector<8x32xf32>
    %203 = tpu.matmul %200, %18, %cst_64 {dimension_numbers = #tpu.dot_dimension_numbers<[1], [0], [0], [1], [0, 0, 1, 1], [], []>} : vector<8x32xf32>, vector<32x32xf32>, vector<8x32xf32> -> vector<8x32xf32>
    %204 = arith.addf %203, %19 : vector<8x32xf32>
    %205 = vector.extract_strided_slice %5 {offsets = [56, 0], sizes = [8, 32], strides = [1, 1]} : vector<64x32xf32> to vector<8x32xf32>
    %206 = arith.addf %205, %201 : vector<8x32xf32>
    %207 = arith.negf %206 : vector<8x32xf32>
    %208 = math.exp %207 : vector<8x32xf32>
    %cst_65 = arith.constant 1.000000e+00 : f32
    %209 = vector.broadcast %cst_65 : f32 to vector<8x32xf32>
    %210 = arith.addf %209, %208 : vector<8x32xf32>
    %211 = arith.divf %209, %210 : vector<8x32xf32>
    %212 = vector.extract_strided_slice %10 {offsets = [56, 0], sizes = [8, 32], strides = [1, 1]} : vector<64x32xf32> to vector<8x32xf32>
    %213 = arith.addf %212, %202 : vector<8x32xf32>
    %214 = arith.negf %213 : vector<8x32xf32>
    %215 = math.exp %214 : vector<8x32xf32>
    %cst_66 = arith.constant 1.000000e+00 : f32
    %216 = vector.broadcast %cst_66 : f32 to vector<8x32xf32>
    %217 = arith.addf %216, %215 : vector<8x32xf32>
    %218 = arith.divf %216, %217 : vector<8x32xf32>
    %219 = vector.extract_strided_slice %15 {offsets = [56, 0], sizes = [8, 32], strides = [1, 1]} : vector<64x32xf32> to vector<8x32xf32>
    %220 = arith.mulf %211, %204 : vector<8x32xf32>
    %221 = arith.addf %219, %220 : vector<8x32xf32>
    %222 = math.tanh %221 : vector<8x32xf32>
    %cst_67 = arith.constant 1.000000e+00 : f32
    %223 = vector.broadcast %cst_67 : f32 to vector<8x32xf32>
    %224 = arith.subf %223, %218 : vector<8x32xf32>
    %225 = arith.mulf %224, %222 : vector<8x32xf32>
    %226 = arith.mulf %218, %200 : vector<8x32xf32>
    %227 = arith.addf %225, %226 : vector<8x32xf32>
    %228 = vector.extract_strided_slice %227 {offsets = [0, 0], sizes = [1, 32], strides = [1, 1]} : vector<8x32xf32> to vector<1x32xf32>
    %229 = vector.extract_strided_slice %227 {offsets = [2, 0], sizes = [1, 32], strides = [1, 1]} : vector<8x32xf32> to vector<1x32xf32>
    %230 = arith.mulf %228, %229 : vector<1x32xf32>
    %cst_68 = arith.constant dense<0.000000e+00> : vector<1xf32>
    %231 = vector.multi_reduction <add>, %230, %cst_68 [1] : vector<1x32xf32> to vector<1xf32>
    %232 = vector.shape_cast %231 : vector<1xf32> to vector<1x1xf32>
    %c0_69 = arith.constant 0 : index
    %c0_70 = arith.constant 0 : index
    %233 = vector.load %arg11[%c0_69, %c0_70] : memref<1x1xf32, #tpu.memory_space<vmem>>, vector<1x1xf32>
    tpu.vector_store %arg11[%c0_69, %c0_70], %232 {strides = array<i32>} : memref<1x1xf32, #tpu.memory_space<vmem>>, vector<1x1xf32>,
    return
  }
}

</mosaic_0001>

<bundles_post_ra>
// kernel: pair_encoder.1
= control target key start
LH: loop header
LB: loop body
LE: loop exit
PB: predicated region body
PF: predicated region fallthrough
CT: control target
= control target key end

     0   :  { %16 = vsyncpa [#allocation3], 0  ;;  %s3445_s0 = inlined_call_operand.vmem [shape: f32[64,32], index: 0, kind: input, shape index: {}]   ;;  %s3446_s1 = inlined_call_operand.vmem [shape: f32[32,32], index: 1, kind: input, shape index: {}]   ;;  %s3447_s2 = inlined_call_operand.vmem [shape: f32[32,32], index: 2, kind: input, shape index: {}]   ;;  %s3448_s3 = inlined_call_operand.vmem [shape: f32[32,32], index: 3, kind: input, shape index: {}]   ;;  %s3449_s4 = inlined_call_operand.hbm [shape: f32[32,32], index: 4, kind: input, shape index: {}]   ;;  %s3450_s5 = inlined_call_operand.hbm [shape: f32[32,32], index: 5, kind: input, shape index: {}]   ;;  %s3451_s6 = inlined_call_operand.hbm [shape: f32[32,32], index: 6, kind: input, shape index: {}]   ;;  %s3452_s7 = inlined_call_operand.vmem [shape: f32[1,32], index: 7, kind: input, shape index: {}]   ;;  %s3453_s8 = inlined_call_operand.vmem [shape: f32[1,32], index: 8, kind: input, shape index: {}]   ;;  %s3454_s9 = inlined_call_operand.vmem [shape: f32[1,32], index: 9, kind: input, shape index: {}]   ;;  %s3455_s10 = inlined_call_operand.vmem [shape: f32[8,32], index: 10, kind: input, shape index: {}]   ;;  %s3456_s11 = inlined_call_operand.hbm [shape: f32[1,1], index: 11, kind: output, shape index: {}]  }
   0x1   :  { %17 = vsyncpa [#allocation6], 0 }
   0x2   :  { %18 = vsyncpa [#allocation4], 0  ;;  %s2984_s17 = smov [#allocation5]   ;;  %s2985_s19 = smov [#allocation2]  }
   0x3   :  { %s44_s18 = sshll.u32 %s2984_s17, 4  ;;  %s32_s20 = sshll.u32 %s2985_s19, 4  ;;  %s45_s18 = int_to_ptr.vmem [resolvable:$true] %s44_s18  ;;  %s3053_s20 = int_to_ptr.vmem [resolvable:$true] %s32_s20 }
   0x4   :  { %s2890_s23 = scalar_lea.hbm %s3450_s5, 512 }
   0x5   :  { %p2891_p0 = scmp.ne.s32.totalorder %s3450_s5, %s2890_s23  ;;  %p2894_p1 = scmp.lt.u32.totalorder %s2890_s23, %s3450_s5 }
   0x7   :  { %p2896_p2 = pnand %p2894_p1, %p2891_p0 }
   0x9   :  { %2899 = shalt.err (!%p2896_p2)
}
   0xa   :  { %s2900_s28 = scalar_lea.vmem %s45_s18, 512  ;;  %p2905_p4 = scmp.lt.s32.totalorder %s45_s18, %s45_s18 }
   0xb   :  { %p2901_p3 = scmp.ne.s32.totalorder %s45_s18, %s2900_s28  ;;  %p2906_p5 = scmp.lt.s32.totalorder %s2900_s28, %s2900_s28 }
   0xd   :  { %p2907_p6 = por %p2906_p5, %p2905_p4 }
   0xf   :  { %p2908_p7 = pnand %p2907_p6, %p2901_p3 }
  0x11   :  { %2911 = shalt.err (!%p2908_p7)
}
  0x12   :  { %s2986_s29 = smov 128   ;;  %s2987_s30 = smov 8  }
  0x13   :  { %50 = dma.hbm_to_vmem [thread:$0]  %s3450_s5, 512, %s45_s18, [#allocation6], %s2986_s29, %s2986_s29, %s2987_s30  }
  0x14   :  { %s2912_s16 = scalar_lea.hbm %s3449_s4, 512 }
  0x15   :  { %p2913_p8 = scmp.ne.s32.totalorder %s3449_s4, %s2912_s16  ;;  %p2916_p9 = scmp.lt.u32.totalorder %s2912_s16, %s3449_s4 }
  0x17   :  { %p2918_p10 = pnand %p2916_p9, %p2913_p8 }
  0x19   :  { %2921 = shalt.err (!%p2918_p10)
}
  0x1a   :  { %s2922_s23 = scalar_lea.vmem %s3053_s20, 512  ;;  %p2927_p12 = scmp.lt.s32.totalorder %s3053_s20, %s3053_s20 }
  0x1b   :  { %p2923_p11 = scmp.ne.s32.totalorder %s3053_s20, %s2922_s23  ;;  %p2928_p13 = scmp.lt.s32.totalorder %s2922_s23, %s2922_s23 }
  0x1d   :  { %p2929_p0 = por %p2928_p13, %p2927_p12 }
  0x1f   :  { %p2930_p1 = pnand %p2929_p0, %p2923_p11 }
  0x21   :  { %2933 = shalt.err (!%p2930_p1)
}
  0x22   :  { %38 = dma.hbm_to_vmem [thread:$0]  %s3449_s4, 512, %s3053_s20, [#allocation3], %s2986_s29, %s2986_s29, %s2987_s30  }
  0x23   :  { %s2988_s24 = smov [#allocation7]   ;;  %s2934_s28 = scalar_lea.hbm %s3451_s6, 512 }
  0x24   :  { %s56_s25 = sshll.u32 %s2988_s24, 4  ;;  %p2935_p2 = scmp.ne.s32.totalorder %s3451_s6, %s2934_s28  ;;  %s57_s25 = int_to_ptr.vmem [resolvable:$true] %s56_s25 }
  0x25   :  { %p2938_p3 = scmp.lt.u32.totalorder %s2934_s28, %s3451_s6 }
  0x27   :  { %p2940_p4 = pnand %p2938_p3, %p2935_p2 }
  0x29   :  { %2943 = shalt.err (!%p2940_p4)
}
  0x2a   :  { %s2944_s16 = scalar_lea.vmem %s57_s25, 512  ;;  %p2949_p6 = scmp.lt.s32.totalorder %s57_s25, %s57_s25 }
  0x2b   :  { %p2945_p5 = scmp.ne.s32.totalorder %s57_s25, %s2944_s16  ;;  %p2950_p7 = scmp.lt.s32.totalorder %s2944_s16, %s2944_s16 }
  0x2d   :  { %p2951_p8 = por %p2950_p7, %p2949_p6 }
  0x2f   :  { %p2952_p9 = pnand %p2951_p8, %p2945_p5 }
  0x31   :  { %2955 = shalt.err (!%p2952_p9)
}
  0x32   :  { %62 = dma.hbm_to_vmem [thread:$0]  %s3451_s6, 512, %s57_s25, [#allocation6], %s2986_s29, %s2986_s29, %s2987_s30  }
  0x33   :  { %2978 = dma.done.wait [#allocation3], 512  }
  0x34   :  { %2979 = vsyncadd [#allocation3], 4294966784 }
  0x35   :  { %2980 = dma.done.wait [#allocation6], 1024  }
  0x36   :  { %2981 = vsyncadd [#allocation6], 4294966272  ;;  %vm99_vm0 = vcmask 261120   ;;  %v88_v0 = vld [vmem:[%s3446_s1] sm:$0xff]  ;;  %v89_v1 = vld [vmem:[%s3446_s1 + $0x8] sm:$0xff]  ;;  %v2989_v31 = vmov 0.0|0.0  }
  0x37   :  { %v90_v2 = vld [vmem:[%s3446_s1 + $0x10] sm:$0xff]  ;;  %v2651_v3 = vpack.c.bf16 %v89_v1, %v88_v0  ;;  %v91_v4 = vld [vmem:[%s3446_s1 + $0x18] sm:$0xff]  ;;  %v80_v5 = vld [vmem:[%s3445_s0] sm:$0xff]  ;;  %vm2990_vm1 = vmmov 0   ;;  %v2991_v39 = vmov 0.0   ;;  %vm2133_vm2 = vcmask 253952  }
  0x38   :  { %v2655_v6 = vpack.c.bf16 %v91_v4, %v90_v2  ;;  %2368 = vmatprep.mubr.msk.f32.mxu0 %vm99_vm0, %v80_v5  ;;  %v229_v7 = vld [vmem:[%s3447_s2] sm:$0xff]  ;;  %v230_v8 = vld [vmem:[%s3447_s2 + $0x8] sm:$0xff]  ;;  %v231_v9 = vld [vmem:[%s3447_s2 + $0x10] sm:$0xff]  ;;  %2388 = vmatprep.mubr.msk.f32.mxu1 %vm99_vm0, %v80_v5  ;;  %vm2137_vm3 = vcmask 0  }
  0x39   :  { %2652 = vmatprep.subr.bf16.mxu0 %v2651_v3  ;;  %v2659_v10 = vpack.c.bf16 %v230_v8, %v229_v7  ;;  %v232_v11 = vld [vmem:[%s3447_s2 + $0x18] sm:$0xff]  ;;  %v345_v12 = vld [vmem:[%s3448_s3] sm:$0xff]  ;;  %v346_v13 = vld [vmem:[%s3448_s3 + $0x8] sm:$0xff] }
  0x3a   :  { %2654 = vmatpush3.bf16.msra.mxu0 %v2651_v3  ;;  %v2663_v14 = vpack.c.bf16 %v232_v11, %v231_v9  ;;  %v2667_v15 = vpack.c.bf16 %v346_v13, %v345_v12  ;;  %v347_v16 = vld [vmem:[%s3448_s3 + $0x10] sm:$0xff]  ;;  %v348_v17 = vld [vmem:[%s3448_s3 + $0x18] sm:$0xff]  ;;  %v81_v18 = vld [vmem:[%s3445_s0 + $0x8] sm:$0xff] }
  0x3b   :  { %2656 = vmatprep.subr.bf16.mxu0 %v2655_v6  ;;  %2660 = vmatprep.subr.bf16.mxu1 %v2659_v10  ;;  %v82_v19 = vld [vmem:[%s3445_s0 + $0x10] sm:$0xff]  ;;  %v2671_v20 = vpack.c.bf16 %v348_v17, %v347_v16  ;;  %v83_v21 = vld [vmem:[%s3445_s0 + $0x18] sm:$0xff]  ;;  %v84_v22 = vld [vmem:[%s3445_s0 + $0x20] sm:$0xff] }
  0x3c   :  { %2662 = vmatpush3.bf16.msra.mxu1 %v2659_v10  ;;  %v85_v23 = vld [vmem:[%s3445_s0 + $0x28] sm:$0xff]  ;;  %v86_v24 = vld [vmem:[%s3445_s0 + $0x30] sm:$0xff]  ;;  %v87_v25 = vld [vmem:[%s3445_s0 + $0x38] sm:$0xff] }
  0x3d   :  { %2664 = vmatprep.subr.bf16.mxu1 %v2663_v14  ;;  %v461_v26 = vld [vmem:[#allocation2] sm:$0xff]  ;;  %v462_v27 = vld [vmem:[#allocation2 + $0x8] sm:$0xff]  ;;  %v463_v33 = vld [vmem:[#allocation2 + $0x10] sm:$0xff] }
  0x3e   :  { %2658 = vmatpush3.bf16.msra.mxu0 %v2655_v6  ;;  %v3189_v28 = vpack.c.bf16 %v462_v27, %v461_v26  ;;  %v469_v29 = vld [vmem:[#allocation7] sm:$0xff]  ;;  %v470_v30 = vld [vmem:[#allocation7 + $0x8] sm:$0xff]  ;;  %v464_v34 = vld [vmem:[#allocation2 + $0x18] sm:$0xff] }
  0x3f   :  { %2668 = vmatprep.subr.bf16.mxu0 %v2667_v15  ;;  %v3193_v32 = vpack.c.bf16 %v470_v30, %v469_v29  ;;  %v3198_v35 = vpack.c.bf16 %v464_v34, %v463_v33  ;;  %v471_v36 = vld [vmem:[#allocation7 + $0x10] sm:$0xff]  ;;  %v472_v37 = vld [vmem:[#allocation7 + $0x18] sm:$0xff]  ;;  %v2155_v40 = vld [vmem:[%s3452_s7] ss:$0 sm:$0xff] }
  0x40   :  { %2666 = vmatpush3.bf16.msra.mxu1 %v2663_v14  ;;  %v3201_v38 = vpack.c.bf16 %v472_v37, %v471_v36  ;;  %v2164_v42 = vld [vmem:[%s3453_s8] ss:$0 sm:$0xff] }
  0x41   :  { %2369 = vmatmul.mubr.msk.f32.vlgmr.msra.gmra.mrb[0].mxu0 %vm99_vm0, %v81_v18  ;;  %2675 = vmatprep.subr.bf16.mxu1 %v2989_v31  ;;  %v2173_v8 = vld [vmem:[%s3454_s9] ss:$0 sm:$0xff] }
  0x42   :  { %2670 = vmatpush3.bf16.msra.mxu0 %v2667_v15  ;;  %2371 = vmatprep.mubr.msk.f32.mxu0 %vm99_vm0, %v82_v19  ;;  %v3261_v29 = vld [vmem:[%s3455_s10] sm:$0xff]  ;;  %s2992_s10 = smov [#allocation8]  }
  0x43   :  { %2389 = vmatmul.mubr.msk.f32.vlgmr.msra.gmra.mrb[0].mxu1 %vm99_vm0, %v81_v18  ;;  %2672 = vmatprep.subr.bf16.mxu0 %v2671_v20  ;;  %s2145_s15 = sshll.u32 %s2992_s10, 4  ;;  %s2146_s15 = int_to_ptr.vmem [resolvable:$true] %s2145_s15 }
  0x44   :  { %2391 = vmatprep.mubr.msk.f32.mxu1 %vm99_vm0, %v82_v19  ;;  %2677 = vmatpush3.bf16.msra.mxu1 %v3189_v28  ;;  %s2956_s16 = scalar_lea.vmem %s2146_s15, 16  ;;  %s2960_s4 = scalar_lea.vmem %s2146_s15, 32 }
  0x45   :  { %2372 = vmatmul.mubr.msk.f32.gmra.mrb[2].mxu0 %vm99_vm0, %v83_v21  ;;  %2678 = vmatprep.subr.bf16.mxu1 %v2989_v31  ;;  %p2957_p10 = scmp.ne.s32.totalorder %s2146_s15, %s2956_s16  ;;  %p2961_p11 = scmp.lt.s32.totalorder %s2146_s15, %s2146_s15 }
  0x46   :  { %2374 = vmatprep.mubr.msk.f32.mxu0 %vm99_vm0, %v84_v22  ;;  %2674 = vmatpush3.bf16.msra.mxu0 %v2671_v20  ;;  %p2962_p12 = scmp.lt.s32.totalorder %s2960_s4, %s2956_s16 }
  0x47   :  { %2392 = vmatmul.mubr.msk.f32.gmra.mrb[2].mxu1 %vm99_vm0, %v83_v21  ;;  %2687 = vmatprep.subr.bf16.mxu0 %v2989_v31 }
  0x48   :  { %2394 = vmatprep.mubr.msk.f32.mxu1 %vm99_vm0, %v84_v22  ;;  %2680 = vmatpush3.bf16.msra.mxu1 %v3198_v35  ;;  %p2963_p13 = por %p2962_p12, %p2961_p11 }
  0x49   :  { %2375 = vmatmul.mubr.msk.f32.gmra.mrb[4].mxu0 %vm99_vm0, %v85_v23  ;;  %2681 = vmatprep.subr.bf16.mxu1 %v2989_v31 }
  0x4a   :  { %2377 = vmatprep.mubr.msk.f32.mxu0 %vm99_vm0, %v86_v24  ;;  %p2964_p0 = pnand %p2963_p13, %p2957_p10 }
  0x4b   :  { %2395 = vmatmul.mubr.msk.f32.gmra.mrb[4].mxu1 %vm99_vm0, %v85_v23 }
  0x4c   :  { %2397 = vmatprep.mubr.msk.f32.mxu1 %vm99_vm0, %v86_v24 }
  0x4d   :  { %2378 = vmatmul.mubr.msk.f32.gmra.mrb[6].mxu0 %vm99_vm0, %v87_v25 }
  0x4e   :  { %2408 = vmatprep.mubr.msk.f32.mxu0 %vm99_vm0, %v80_v5 }
  0x4f   :  { %2398 = vmatmul.mubr.msk.f32.gmra.mrb[6].mxu1 %vm99_vm0, %v87_v25 }
  0x50   :  { %2428 = vmatprep.mubr.msk.f32.mxu1 %vm2990_vm1, %v2991_v39 }
  0x51   :  { %2409 = vmatmul.mubr.msk.f32.vlgmr.msra.gmra.mrb[8].mxu0 %vm99_vm0, %v81_v18 }
  0x52   :  { %2411 = vmatprep.mubr.msk.f32.mxu0 %vm99_vm0, %v82_v19  ;;  %2689 = vmatpush3.bf16.msra.mxu0 %v3193_v32 }
  0x53   :  { %2690 = vmatprep.subr.bf16.mxu0 %v2989_v31 }
  0x55   :  { %2412 = vmatmul.mubr.msk.f32.gmra.mrb[10].mxu0 %vm99_vm0, %v83_v21 }
  0x56   :  { %2414 = vmatprep.mubr.msk.f32.mxu0 %vm99_vm0, %v84_v22  ;;  %2692 = vmatpush3.bf16.msra.mxu0 %v3201_v38 }
  0x57   :  { %2699 = vmatprep.subr.bf16.mxu0 %v2989_v31 }
  0x59   :  { %2415 = vmatmul.mubr.msk.f32.gmra.mrb[12].mxu0 %vm99_vm0, %v85_v23 }
  0x5a   :  { %2417 = vmatprep.mubr.msk.f32.mxu0 %vm99_vm0, %v86_v24 }
  0x5d   :  { %2418 = vmatmul.mubr.msk.f32.gmra.mrb[14].mxu0 %vm99_vm0, %v87_v25 }
  0x5e   :  { %2450 = vmatprep.mubr.msk.f32.mxu0 %vm2990_vm1, %v2991_v39 }
 0x114   :  { %v2370_v41 = vpop.f32.mrb[0].mxu0 }
 0x115   :  { %v3217_v43 = vadd.f32 %v2370_v41, %v2155_v40  ;;  %v190_v44 = vpop.f32.mrb[1].mxu0 }
 0x116   :  { %v191_v45 = vadd.f32 %v2155_v40, %v190_v44  ;;  %v2390_v46 = vpop.f32.mrb[0].mxu1 }
 0x117   :  { %v3219_v47 = vadd.f32 %v2390_v46, %v2164_v42  ;;  %v306_v48 = vpop.f32.mrb[1].mxu1  ;;  %v465_v46 = vld [vmem:[#allocation5] sm:$0xff] }
 0x118   :  { %v2182_v49 = vmul.f32 -1.442695, %v191_v45  ;;  %v307_v50 = vadd.f32 %v2164_v42, %v306_v48  ;;  %v2373_v51 = vpop.f32.mrb[2].mxu0  ;;  %v466_v48 = vld [vmem:[#allocation5 + $0x8] sm:$0xff] }
 0x119   :  { %v3221_v52 = vadd.f32 %v2373_v51, %v2155_v40  ;;  %v200_v53 = vpop.f32.mrb[3].mxu0 }
 0x11a   :  { %2810 = vpow2.f32 %v2182_v49  ;;  %v3223_v54 = vadd.f32 %v2155_v40, %v200_v53  ;;  %v2393_v55 = vpop.f32.mrb[2].mxu1  ;;  %v2183_v56 = vmul.f32 -1.442695, %v307_v50  ;;  %v3268_v50 = vpack.c.bf16 %v466_v48, %v465_v46  ;;  %v467_v53 = vld [vmem:[#allocation5 + $0x10] sm:$0xff] }
 0x11b   :  { %v3225_v57 = vadd.f32 %v2393_v55, %v2164_v42  ;;  %v316_v58 = vpop.f32.mrb[3].mxu1  ;;  %v468_v55 = vld [vmem:[#allocation5 + $0x18] sm:$0xff] }
 0x11c   :  { %v2376_v59 = vpop.f32.mrb[4].mxu0  ;;  %v3227_v60 = vadd.f32 %v2164_v42, %v316_v58  ;;  %2812 = vpow2.f32 %v2183_v56  ;;  %v3273_v56 = vpack.c.bf16 %v468_v55, %v467_v53 }
 0x11d   :  { %v3229_v61 = vadd.f32 %v2376_v59, %v2155_v40  ;;  %v210_v62 = vpop.f32.mrb[5].mxu0 }
 0x11e   :  { %v3231_v63 = vadd.f32 %v2155_v40, %v210_v62  ;;  %v2396_v0 = vpop.f32.mrb[4].mxu1 }
 0x11f   :  { %v3233_v1 = vadd.f32 %v2396_v0, %v2164_v42  ;;  %v326_v2 = vpop.f32.mrb[5].mxu1 }
 0x120   :  { %v2379_v3 = vpop.f32.mrb[6].mxu0  ;;  %v3235_v4 = vadd.f32 %v2164_v42, %v326_v2 }
 0x121   :  { %v3237_v5 = vadd.f32 %v2379_v3, %v2155_v40  ;;  %v220_v6 = vpop.f32.mrb[7].mxu0 }
 0x122   :  { %v3239_v7 = vadd.f32 %v2155_v40, %v220_v6  ;;  %v2399_v9 = vpop.f32.mrb[6].mxu1 }
 0x123   :  { %v3244_v10 = vadd.f32 %v2399_v9, %v2164_v42  ;;  %v336_v11 = vpop.f32.mrb[7].mxu1 }
 0x124   :  { %v2811_v12 = vpop.eup %2810  ;;  %v2410_v13 = vpop.f32.mrb[8].mxu0  ;;  %v3246_v14 = vadd.f32 %v2164_v42, %v336_v11 }
 0x125   :  { %v477_v15 = vadd.f32 1.0, %v2811_v12  ;;  %v3248_v16 = vadd.f32 %v2410_v13, %v2173_v8  ;;  %v422_v17 = vpop.f32.mrb[9].mxu0 }
 0x126   :  { %v2813_v19 = vpop.eup %2812  ;;  %v423_v30 = vadd.f32 %v2173_v8, %v422_v17 }
 0x127   :  { %2814 = vrcp.f32 %v477_v15  ;;  %v483_v23 = vadd.f32 1.0, %v2813_v19 }
 0x128   :  { %v2413_v18 = vpop.f32.mrb[10].mxu0 }
 0x129   :  { %v3250_v20 = vadd.f32 %v2413_v18, %v2173_v8  ;;  %v432_v21 = vpop.f32.mrb[11].mxu0  ;;  %2816 = vrcp.f32 %v483_v23 }
 0x12a   :  { %v3252_v22 = vadd.f32 %v2173_v8, %v432_v21 }
 0x12c   :  { %v2416_v24 = vpop.f32.mrb[12].mxu0 }
 0x12d   :  { %v3254_v25 = vadd.f32 %v2416_v24, %v2173_v8  ;;  %v442_v26 = vpop.f32.mrb[13].mxu0 }
 0x12e   :  { %v3256_v27 = vadd.f32 %v2173_v8, %v442_v26 }
 0x130   :  { %v2419_v33 = vpop.f32.mrb[14].mxu0 }
 0x131   :  { %v2815_v34 = vpop.eup %2814  ;;  %v3263_v36 = vadd.f32 %v2419_v33, %v2173_v8  ;;  %v452_v37 = vpop.f32.mrb[15].mxu0 }
 0x132   :  { %v486_v40 = vmul.f32 %v2815_v34, %v3261_v29  ;;  %v3266_v41 = vadd.f32 %v2173_v8, %v452_v37 }
 0x133   :  { %v2817_v44 = vpop.eup %2816 }
 0x134   :  { %v487_v42 = vadd.f32 %v486_v40, %v423_v30  ;;  %v489_v45 = vsub.f32 1.0, %v2817_v44 }
 0x136   :  { %2818 = vtanh.f32 %v487_v42 }
 0x140   :  { %v2819_v49 = vpop.eup %2818 }
 0x141   :  { %v490_v51 = vmul.f32 %v2819_v49, %v489_v45 }
 0x143   :  { %2429 = vmatmul.mubr.msk.f32.vlgmr.msra.gmra.mrb[8].mxu1 %vm99_vm0, %v490_v51  ;;  %2451 = vmatmul.mubr.msk.f32.vlgmr.msra.gmra.mrb[16].mxu0 %vm99_vm0, %v490_v51 }
 0x144   :  { %2683 = vmatpush3.bf16.msra.mxu1 %v3268_v50  ;;  %2439 = vmatprep.mubr.msk.f32.mxu1 %vm2990_vm1, %v2991_v39 }
 0x145   :  { %2684 = vmatprep.subr.bf16.mxu1 %v2989_v31  ;;  %2701 = vmatpush3.bf16.msra.mxu0 %v3268_v50 }
 0x146   :  { %2702 = vmatprep.subr.bf16.mxu0 %v2989_v31  ;;  %2472 = vmatprep.mubr.msk.f32.mxu0 %vm2990_vm1, %v2991_v39 }
 0x148   :  { %2686 = vmatpush3.bf16.msra.mxu1 %v3273_v56 }
 0x149   :  { %2693 = vmatprep.subr.bf16.mxu1 %v2989_v31  ;;  %2704 = vmatpush3.bf16.msra.mxu0 %v3273_v56 }
 0x14a   :  { %2711 = vmatprep.subr.bf16.mxu0 %v2989_v31 }
 0x14b   :  { %2440 = vmatmul.mubr.msk.f32.vlgmr.msra.gmra.mrb[10].mxu1 %vm99_vm0, %v490_v51 }
 0x14c   :  { %2695 = vmatpush3.bf16.msra.mxu1 %v3189_v28  ;;  %2461 = vmatprep.mubr.msk.f32.mxu1 %vm2990_vm1, %v2991_v39 }
 0x14d   :  { %2696 = vmatprep.subr.bf16.mxu1 %v2989_v31 }
 0x150   :  { %2698 = vmatpush3.bf16.msra.mxu1 %v3198_v35 }
 0x151   :  { %2705 = vmatprep.subr.bf16.mxu1 %v2989_v31 }
 0x216   :  { %v560_v58 = vpop.f32.mrb[8].mxu1  ;;  %v700_v59 = vpop.f32.mrb[16].mxu0 }
 0x217   :  { %v704_v62 = vadd.f32 %v560_v58, %v3217_v43  ;;  %v2430_v0 = vpop.f32.mrb[9].mxu1  ;;  %v2452_v2 = vpop.f32.mrb[17].mxu0  ;;  %v701_v18 = vadd.f32 %v700_v59, %v3261_v29 }
 0x219   :  { %v2187_v3 = vmul.f32 -1.442695, %v704_v62 }
 0x21b   :  { %2820 = vpow2.f32 %v2187_v3 }
 0x21e   :  { %v630_v6 = vpop.f32.mrb[10].mxu1 }
 0x21f   :  { %v711_v8 = vadd.f32 %v630_v6, %v3219_v47  ;;  %v2441_v9 = vpop.f32.mrb[11].mxu1 }
 0x221   :  { %v2188_v11 = vmul.f32 -1.442695, %v711_v8 }
 0x223   :  { %2822 = vpow2.f32 %v2188_v11 }
 0x225   :  { %v2821_v12 = vpop.eup %2820 }
 0x226   :  { %v708_v13 = vadd.f32 1.0, %v2821_v12 }
 0x228   :  { %2824 = vrcp.f32 %v708_v13 }
 0x22d   :  { %v2823_v15 = vpop.eup %2822 }
 0x22e   :  { %v715_v17 = vadd.f32 1.0, %v2823_v15 }
 0x230   :  { %2826 = vrcp.f32 %v715_v17 }
 0x232   :  { %v2825_v19 = vpop.eup %2824 }
 0x233   :  { %v718_v21 = vmul.f32 %v2825_v19, %v701_v18 }
 0x235   :  { %v719_v43 = vadd.f32 %v718_v21, %v3248_v16 }
 0x237   :  { %2828 = vtanh.f32 %v719_v43 }
 0x23a   :  { %v2827_v23 = vpop.eup %2826 }
 0x23b   :  { %v721_v24 = vsub.f32 1.0, %v2827_v23  ;;  %v723_v30 = vmul.f32 %v2827_v23, %v490_v51 }
 0x241   :  { %v2829_v26 = vpop.eup %2828 }
 0x242   :  { %v722_v47 = vmul.f32 %v2829_v26, %v721_v24 }
 0x244   :  { %v724_v33 = vadd.f32 %v723_v30, %v722_v47 }
 0x246   :  { %2462 = vmatmul.mubr.msk.f32.vlgmr.msra.gmra.mrb[12].mxu1 %vm99_vm0, %v724_v33  ;;  %2473 = vmatmul.mubr.msk.f32.vlgmr.msra.gmra.mrb[18].mxu0 %vm99_vm0, %v724_v33 }
 0x247   :  { %2707 = vmatpush3.bf16.msra.mxu1 %v3193_v32  ;;  %2483 = vmatprep.mubr.msk.f32.mxu1 %vm2990_vm1, %v2991_v39 }
 0x248   :  { %2708 = vmatprep.subr.bf16.mxu1 %v2989_v31  ;;  %2713 = vmatpush3.bf16.msra.mxu0 %v3189_v28 }
 0x249   :  { %2714 = vmatprep.subr.bf16.mxu0 %v2989_v31  ;;  %2494 = vmatprep.mubr.msk.f32.mxu0 %vm2990_vm1, %v2991_v39 }
 0x24b   :  { %2710 = vmatpush3.bf16.msra.mxu1 %v3201_v38 }
 0x24c   :  { %2717 = vmatprep.subr.bf16.mxu1 %v2989_v31  ;;  %2716 = vmatpush3.bf16.msra.mxu0 %v3198_v35 }
 0x24d   :  { %2723 = vmatprep.subr.bf16.mxu0 %v2989_v31 }
 0x24e   :  { %2484 = vmatmul.mubr.msk.f32.vlgmr.msra.gmra.mrb[14].mxu1 %vm99_vm0, %v724_v33 }
 0x24f   :  { %2719 = vmatpush3.bf16.msra.mxu1 %v3268_v50  ;;  %2505 = vmatprep.mubr.msk.f32.mxu1 %vm2990_vm1, %v2991_v39 }
 0x250   :  { %2720 = vmatprep.subr.bf16.mxu1 %v2989_v31 }
 0x253   :  { %2722 = vmatpush3.bf16.msra.mxu1 %v3273_v56 }
 0x254   :  { %2729 = vmatprep.subr.bf16.mxu1 %v2989_v31 }
 0x319   :  { %v794_v16 = vpop.f32.mrb[12].mxu1  ;;  %v864_v34 = vpop.f32.mrb[18].mxu0 }
 0x31a   :  { %v938_v37 = vadd.f32 %v794_v16, %v3223_v54  ;;  %v945_v40 = vadd.f32 %v864_v34, %v3227_v60  ;;  %v2463_v42 = vpop.f32.mrb[13].mxu1  ;;  %v2474_v44 = vpop.f32.mrb[19].mxu0 }
 0x31c   :  { %v2192_v45 = vmul.f32 -1.442695, %v938_v37  ;;  %v2193_v46 = vmul.f32 -1.442695, %v945_v40 }
 0x31e   :  { %2830 = vpow2.f32 %v2192_v45 }
 0x31f   :  { %2832 = vpow2.f32 %v2193_v46 }
 0x321   :  { %v934_v48 = vpop.f32.mrb[14].mxu1 }
 0x322   :  { %v2485_v49 = vpop.f32.mrb[15].mxu1  ;;  %v935_v59 = vadd.f32 %v934_v48, %v3261_v29 }
 0x328   :  { %v2831_v51 = vpop.eup %2830 }
 0x329   :  { %v942_v53 = vadd.f32 1.0, %v2831_v51  ;;  %v2833_v55 = vpop.eup %2832 }
 0x32a   :  { %v949_v58 = vadd.f32 1.0, %v2833_v55 }
 0x32b   :  { %2834 = vrcp.f32 %v942_v53 }
 0x32c   :  { %2836 = vrcp.f32 %v949_v58 }
 0x335   :  { %v2835_v62 = vpop.eup %2834 }
 0x336   :  { %v952_v54 = vmul.f32 %v2835_v62, %v935_v59  ;;  %v2837_v0 = vpop.eup %2836 }
 0x337   :  { %v955_v2 = vsub.f32 1.0, %v2837_v0  ;;  %v957_v8 = vmul.f32 %v2837_v0, %v724_v33 }
 0x338   :  { %v953_v60 = vadd.f32 %v952_v54, %v3252_v22 }
 0x33a   :  { %2838 = vtanh.f32 %v953_v60 }
 0x344   :  { %v2839_v3 = vpop.eup %2838 }
 0x345   :  { %v956_v6 = vmul.f32 %v2839_v3, %v955_v2 }
 0x347   :  { %v958_v9 = vadd.f32 %v957_v8, %v956_v6 }
 0x349   :  { %2495 = vmatmul.mubr.msk.f32.vlgmr.msra.gmra.mrb[20].mxu0 %vm99_vm0, %v958_v9  ;;  %2506 = vmatmul.mubr.msk.f32.vlgmr.msra.gmra.mrb[16].mxu1 %vm99_vm0, %v958_v9 }
 0x34a   :  { %2725 = vmatpush3.bf16.msra.mxu0 %v3193_v32  ;;  %2516 = vmatprep.mubr.msk.f32.mxu0 %vm2990_vm1, %v2991_v39 }
 0x34b   :  { %2726 = vmatprep.subr.bf16.mxu0 %v2989_v31  ;;  %2731 = vmatpush3.bf16.msra.mxu1 %v3189_v28 }
 0x34c   :  { %2732 = vmatprep.subr.bf16.mxu1 %v2989_v31  ;;  %2527 = vmatprep.mubr.msk.f32.mxu1 %vm2990_vm1, %v2991_v39 }
 0x34e   :  { %2728 = vmatpush3.bf16.msra.mxu0 %v3201_v38 }
 0x34f   :  { %2735 = vmatprep.subr.bf16.mxu0 %v2989_v31  ;;  %2734 = vmatpush3.bf16.msra.mxu1 %v3198_v35 }
 0x350   :  { %2741 = vmatprep.subr.bf16.mxu1 %v2989_v31 }
 0x351   :  { %2517 = vmatmul.mubr.msk.f32.vlgmr.msra.gmra.mrb[22].mxu0 %vm99_vm0, %v958_v9 }
 0x352   :  { %2737 = vmatpush3.bf16.msra.mxu0 %v3268_v50  ;;  %2538 = vmatprep.mubr.msk.f32.mxu0 %vm2990_vm1, %v2991_v39 }
 0x353   :  { %2738 = vmatprep.subr.bf16.mxu0 %v2989_v31 }
 0x356   :  { %2740 = vmatpush3.bf16.msra.mxu0 %v3273_v56 }
 0x357   :  { %2747 = vmatprep.subr.bf16.mxu0 %v2989_v31 }
 0x41c   :  { %v1028_v22 = vpop.f32.mrb[20].mxu0  ;;  %v1098_v11 = vpop.f32.mrb[16].mxu1 }
 0x41d   :  { %v1172_v12 = vadd.f32 %v1028_v22, %v3221_v52  ;;  %v1179_v13 = vadd.f32 %v1098_v11, %v3225_v57  ;;  %v2496_v15 = vpop.f32.mrb[21].mxu0  ;;  %v2507_v17 = vpop.f32.mrb[17].mxu1 }
 0x41f   :  { %v2197_v18 = vmul.f32 -1.442695, %v1172_v12  ;;  %v2198_v19 = vmul.f32 -1.442695, %v1179_v13 }
 0x421   :  { %2840 = vpow2.f32 %v2197_v18 }
 0x422   :  { %2842 = vpow2.f32 %v2198_v19 }
 0x424   :  { %v1168_v21 = vpop.f32.mrb[22].mxu0 }
 0x425   :  { %v2518_v43 = vpop.f32.mrb[23].mxu0  ;;  %v1169_v30 = vadd.f32 %v1168_v21, %v3261_v29 }
 0x42b   :  { %v2841_v23 = vpop.eup %2840 }
 0x42c   :  { %v1176_v24 = vadd.f32 1.0, %v2841_v23  ;;  %v2843_v26 = vpop.eup %2842 }
 0x42d   :  { %v1183_v47 = vadd.f32 1.0, %v2843_v26 }
 0x42e   :  { %2844 = vrcp.f32 %v1176_v24 }
 0x42f   :  { %2846 = vrcp.f32 %v1183_v47 }
 0x438   :  { %v2845_v33 = vpop.eup %2844 }
 0x439   :  { %v1186_v52 = vmul.f32 %v2845_v33, %v1169_v30  ;;  %v2847_v16 = vpop.eup %2846 }
 0x43a   :  { %v1189_v34 = vsub.f32 1.0, %v2847_v16  ;;  %v1191_v42 = vmul.f32 %v2847_v16, %v958_v9 }
 0x43b   :  { %v1187_v57 = vadd.f32 %v1186_v52, %v3250_v20 }
 0x43d   :  { %2848 = vtanh.f32 %v1187_v57 }
 0x447   :  { %v2849_v37 = vpop.eup %2848 }
 0x448   :  { %v1190_v40 = vmul.f32 %v2849_v37, %v1189_v34 }
 0x44a   :  { %v1192_v44 = vadd.f32 %v1191_v42, %v1190_v40 }
 0x44c   :  { %2528 = vmatmul.mubr.msk.f32.vlgmr.msra.gmra.mrb[18].mxu1 %vm99_vm0, %v1192_v44  ;;  %2539 = vmatmul.mubr.msk.f32.vlgmr.msra.gmra.mrb[24].mxu0 %vm99_vm0, %v1192_v44 }
 0x44d   :  { %2743 = vmatpush3.bf16.msra.mxu1 %v3193_v32  ;;  %2549 = vmatprep.mubr.msk.f32.mxu1 %vm2990_vm1, %v2991_v39 }
 0x44e   :  { %2744 = vmatprep.subr.bf16.mxu1 %v2989_v31  ;;  %2749 = vmatpush3.bf16.msra.mxu0 %v3189_v28 }
 0x44f   :  { %2750 = vmatprep.subr.bf16.mxu0 %v2989_v31  ;;  %2560 = vmatprep.mubr.msk.f32.mxu0 %vm2990_vm1, %v2991_v39 }
 0x451   :  { %2746 = vmatpush3.bf16.msra.mxu1 %v3201_v38 }
 0x452   :  { %2753 = vmatprep.subr.bf16.mxu1 %v2989_v31  ;;  %2752 = vmatpush3.bf16.msra.mxu0 %v3198_v35 }
 0x453   :  { %2759 = vmatprep.subr.bf16.mxu0 %v2989_v31 }
 0x454   :  { %2550 = vmatmul.mubr.msk.f32.vlgmr.msra.gmra.mrb[20].mxu1 %vm99_vm0, %v1192_v44 }
 0x455   :  { %2755 = vmatpush3.bf16.msra.mxu1 %v3268_v50  ;;  %2571 = vmatprep.mubr.msk.f32.mxu1 %vm2990_vm1, %v2991_v39 }
 0x456   :  { %2756 = vmatprep.subr.bf16.mxu1 %v2989_v31 }
 0x459   :  { %2758 = vmatpush3.bf16.msra.mxu1 %v3273_v56 }
 0x45a   :  { %2765 = vmatprep.subr.bf16.mxu1 %v2989_v31 }
 0x51f   :  { %v1262_v20 = vpop.f32.mrb[18].mxu1  ;;  %v1332_v45 = vpop.f32.mrb[24].mxu0 }
 0x520   :  { %v1406_v46 = vadd.f32 %v1262_v20, %v3231_v63  ;;  %v1413_v48 = vadd.f32 %v1332_v45, %v3235_v4  ;;  %v2529_v49 = vpop.f32.mrb[19].mxu1  ;;  %v2540_v51 = vpop.f32.mrb[25].mxu0 }
 0x522   :  { %v2202_v53 = vmul.f32 -1.442695, %v1406_v46  ;;  %v2203_v55 = vmul.f32 -1.442695, %v1413_v48 }
 0x524   :  { %2850 = vpow2.f32 %v2202_v53 }
 0x525   :  { %2852 = vpow2.f32 %v2203_v55 }
 0x527   :  { %v1402_v58 = vpop.f32.mrb[20].mxu1 }
 0x528   :  { %v2551_v59 = vpop.f32.mrb[21].mxu1  ;;  %v1403_v2 = vadd.f32 %v1402_v58, %v3261_v29 }
 0x52e   :  { %v2851_v62 = vpop.eup %2850 }
 0x52f   :  { %v1410_v54 = vadd.f32 1.0, %v2851_v62  ;;  %v2853_v60 = vpop.eup %2852 }
 0x530   :  { %v1417_v0 = vadd.f32 1.0, %v2853_v60 }
 0x531   :  { %2854 = vrcp.f32 %v1410_v54 }
 0x532   :  { %2856 = vrcp.f32 %v1417_v0 }
 0x53b   :  { %v2855_v3 = vpop.eup %2854 }
 0x53c   :  { %v1420_v63 = vmul.f32 %v2855_v3, %v1403_v2  ;;  %v2857_v6 = vpop.eup %2856 }
 0x53d   :  { %v1423_v8 = vsub.f32 1.0, %v2857_v6  ;;  %v1425_v11 = vmul.f32 %v2857_v6, %v1192_v44 }
 0x53e   :  { %v1421_v4 = vadd.f32 %v1420_v63, %v3256_v27 }
 0x540   :  { %2858 = vtanh.f32 %v1421_v4 }
 0x54a   :  { %v2859_v9 = vpop.eup %2858 }
 0x54b   :  { %v1424_v22 = vmul.f32 %v2859_v9, %v1423_v8 }
 0x54d   :  { %v1426_v12 = vadd.f32 %v1425_v11, %v1424_v22 }
 0x54f   :  { %2561 = vmatmul.mubr.msk.f32.vlgmr.msra.gmra.mrb[26].mxu0 %vm99_vm0, %v1426_v12  ;;  %2572 = vmatmul.mubr.msk.f32.vlgmr.msra.gmra.mrb[22].mxu1 %vm99_vm0, %v1426_v12 }
 0x550   :  { %2761 = vmatpush3.bf16.msra.mxu0 %v3193_v32  ;;  %2582 = vmatprep.mubr.msk.f32.mxu0 %vm2990_vm1, %v2991_v39 }
 0x551   :  { %2762 = vmatprep.subr.bf16.mxu0 %v2989_v31  ;;  %2767 = vmatpush3.bf16.msra.mxu1 %v3189_v28 }
 0x552   :  { %2768 = vmatprep.subr.bf16.mxu1 %v2989_v31  ;;  %2593 = vmatprep.mubr.msk.f32.mxu1 %vm2990_vm1, %v2991_v39 }
 0x554   :  { %2764 = vmatpush3.bf16.msra.mxu0 %v3201_v38 }
 0x555   :  { %2771 = vmatprep.subr.bf16.mxu0 %v2989_v31  ;;  %2770 = vmatpush3.bf16.msra.mxu1 %v3198_v35 }
 0x556   :  { %2777 = vmatprep.subr.bf16.mxu1 %v2989_v31 }
 0x557   :  { %2583 = vmatmul.mubr.msk.f32.vlgmr.msra.gmra.mrb[28].mxu0 %vm99_vm0, %v1426_v12 }
 0x558   :  { %2773 = vmatpush3.bf16.msra.mxu0 %v3268_v50  ;;  %2604 = vmatprep.mubr.msk.f32.mxu0 %vm2990_vm1, %v2991_v39 }
 0x559   :  { %2774 = vmatprep.subr.bf16.mxu0 %v2989_v31 }
 0x55c   :  { %2776 = vmatpush3.bf16.msra.mxu0 %v3273_v56 }
 0x55d   :  { %2783 = vmatprep.subr.bf16.mxu0 %v2989_v31 }
 0x622   :  { %v1496_v27 = vpop.f32.mrb[26].mxu0  ;;  %v1566_v13 = vpop.f32.mrb[22].mxu1 }
 0x623   :  { %v1640_v15 = vadd.f32 %v1496_v27, %v3229_v61  ;;  %v1647_v17 = vadd.f32 %v1566_v13, %v3233_v1  ;;  %v2562_v18 = vpop.f32.mrb[27].mxu0  ;;  %v2573_v19 = vpop.f32.mrb[23].mxu1 }
 0x625   :  { %v2207_v21 = vmul.f32 -1.442695, %v1640_v15  ;;  %v2208_v43 = vmul.f32 -1.442695, %v1647_v17 }
 0x627   :  { %2860 = vpow2.f32 %v2207_v21 }
 0x628   :  { %2862 = vpow2.f32 %v2208_v43 }
 0x62a   :  { %v1636_v23 = vpop.f32.mrb[28].mxu0 }
 0x62b   :  { %v2584_v24 = vpop.f32.mrb[29].mxu0  ;;  %v1637_v52 = vadd.f32 %v1636_v23, %v3261_v29 }
 0x631   :  { %v2861_v26 = vpop.eup %2860 }
 0x632   :  { %v1644_v47 = vadd.f32 1.0, %v2861_v26  ;;  %v2863_v30 = vpop.eup %2862 }
 0x633   :  { %v1651_v33 = vadd.f32 1.0, %v2863_v30 }
 0x634   :  { %2864 = vrcp.f32 %v1644_v47 }
 0x635   :  { %2866 = vrcp.f32 %v1651_v33 }
 0x63e   :  { %v2865_v57 = vpop.eup %2864 }
 0x63f   :  { %v1654_v61 = vmul.f32 %v2865_v57, %v1637_v52  ;;  %v2867_v16 = vpop.eup %2866 }
 0x640   :  { %v1657_v34 = vsub.f32 1.0, %v2867_v16  ;;  %v1659_v42 = vmul.f32 %v2867_v16, %v1426_v12 }
 0x641   :  { %v1655_v1 = vadd.f32 %v1654_v61, %v3254_v25 }
 0x643   :  { %2868 = vtanh.f32 %v1655_v1 }
 0x64d   :  { %v2869_v37 = vpop.eup %2868 }
 0x64e   :  { %v1658_v40 = vmul.f32 %v2869_v37, %v1657_v34 }
 0x650   :  { %v1660_v44 = vadd.f32 %v1659_v42, %v1658_v40 }
 0x652   :  { %2594 = vmatmul.mubr.msk.f32.vlgmr.msra.gmra.mrb[24].mxu1 %vm99_vm0, %v1660_v44  ;;  %2605 = vmatmul.mubr.msk.f32.vlgmr.msra.gmra.mrb[30].mxu0 %vm99_vm0, %v1660_v44 }
 0x653   :  { %2779 = vmatpush3.bf16.msra.mxu1 %v3193_v32  ;;  %2615 = vmatprep.mubr.msk.f32.mxu1 %vm2990_vm1, %v2991_v39 }
 0x654   :  { %2780 = vmatprep.subr.bf16.mxu1 %v2989_v31  ;;  %2785 = vmatpush3.bf16.msra.mxu0 %v3189_v28 }
 0x655   :  { %2786 = vmatprep.subr.bf16.mxu0 %v2989_v31  ;;  %2626 = vmatprep.mubr.msk.f32.mxu0 %vm2990_vm1, %v2991_v39 }
 0x657   :  { %2782 = vmatpush3.bf16.msra.mxu1 %v3201_v38 }
 0x658   :  { %2789 = vmatprep.subr.bf16.mxu1 %v2989_v31  ;;  %2788 = vmatpush3.bf16.msra.mxu0 %v3198_v35 }
 0x659   :  { %2795 = vmatprep.subr.bf16.mxu0 %v2989_v31 }
 0x65a   :  { %2616 = vmatmul.mubr.msk.f32.vlgmr.msra.gmra.mrb[26].mxu1 %vm99_vm0, %v1660_v44 }
 0x65b   :  { %2791 = vmatpush3.bf16.msra.mxu1 %v3268_v50  ;;  %2637 = vmatprep.mubr.msk.f32.mxu1 %vm2990_vm1, %v2991_v39 }
 0x65c   :  { %2792 = vmatprep.subr.bf16.mxu1 %v2989_v31 }
 0x65f   :  { %2794 = vmatpush3.bf16.msra.mxu1 %v3273_v56 }
 0x725   :  { %v1730_v28 = vpop.f32.mrb[24].mxu1  ;;  %v1800_v25 = vpop.f32.mrb[30].mxu0 }
 0x726   :  { %v1874_v20 = vadd.f32 %v1730_v28, %v3239_v7  ;;  %v1881_v45 = vadd.f32 %v1800_v25, %v3246_v14  ;;  %v2595_v35 = vpop.f32.mrb[25].mxu1  ;;  %v2606_v46 = vpop.f32.mrb[31].mxu0 }
 0x728   :  { %v2212_v48 = vmul.f32 -1.442695, %v1874_v20  ;;  %v2213_v49 = vmul.f32 -1.442695, %v1881_v45 }
 0x72a   :  { %2870 = vpow2.f32 %v2212_v48 }
 0x72b   :  { %2872 = vpow2.f32 %v2213_v49 }
 0x72d   :  { %v1870_v51 = vpop.f32.mrb[26].mxu1 }
 0x72e   :  { %v2617_v50 = vpop.f32.mrb[27].mxu1  ;;  %v1871_v56 = vadd.f32 %v1870_v51, %v3261_v29 }
 0x734   :  { %v2871_v53 = vpop.eup %2870 }
 0x735   :  { %v1878_v55 = vadd.f32 1.0, %v2871_v53  ;;  %v2873_v58 = vpop.eup %2872 }
 0x736   :  { %v1885_v59 = vadd.f32 1.0, %v2873_v58 }
 0x737   :  { %2874 = vrcp.f32 %v1878_v55 }
 0x738   :  { %2876 = vrcp.f32 %v1885_v59 }
 0x741   :  { %v2875_v62 = vpop.eup %2874 }
 0x742   :  { %v1888_v7 = vmul.f32 %v2875_v62, %v1871_v56  ;;  %v2877_v54 = vpop.eup %2876 }
 0x743   :  { %v1891_v60 = vsub.f32 1.0, %v2877_v54  ;;  %v1893_v3 = vmul.f32 %v2877_v54, %v1660_v44 }
 0x744   :  { %v1889_v14 = vadd.f32 %v1888_v7, %v3266_v41 }
 0x746   :  { %2878 = vtanh.f32 %v1889_v14 }
 0x750   :  { %v2879_v0 = vpop.eup %2878 }
 0x751   :  { %v1892_v2 = vmul.f32 %v2879_v0, %v1891_v60 }
 0x753   :  { %v1894_v63 = vadd.f32 %v1893_v3, %v1892_v2 }
 0x755   :  { %2627 = vmatmul.mubr.msk.f32.vlgmr.msra.gmra.mrb[32].mxu0 %vm99_vm0, %v1894_v63  ;;  %2638 = vmatmul.mubr.msk.f32.vlgmr.msra.gmra.mrb[28].mxu1 %vm99_vm0, %v1894_v63 }
 0x756   :  { %2797 = vmatpush3.bf16.msra.mxu0 %v3193_v32  ;;  %2648 = vmatprep.mubr.msk.f32.mxu0 %vm2990_vm1, %v2991_v39 }
 0x757   :  { %2798 = vmatprep.subr.bf16.mxu0 %v2989_v31 }
 0x75a   :  { %2800 = vmatpush3.bf16.msra.mxu0 %v3201_v38 }
 0x75d   :  { %2649 = vmatmul.mubr.msk.f32.vlgmr.msra.gmra.mrb[34].mxu0 %vm99_vm0, %v1894_v63 }
 0x828   :  { %v1964_v41 = vpop.f32.mrb[32].mxu0  ;;  %v2034_v4 = vpop.f32.mrb[28].mxu1 }
 0x829   :  { %v2108_v6 = vadd.f32 %v1964_v41, %v3237_v5  ;;  %v2115_v8 = vadd.f32 %v2034_v4, %v3244_v10  ;;  %v2628_v9 = vpop.f32.mrb[33].mxu0  ;;  %v2639_v22 = vpop.f32.mrb[29].mxu1 }
 0x82b   :  { %v2217_v11 = vmul.f32 -1.442695, %v2108_v6  ;;  %v2218_v32 = vmul.f32 -1.442695, %v2115_v8 }
 0x82d   :  { %2880 = vpow2.f32 %v2217_v11 }
 0x82e   :  { %2882 = vpow2.f32 %v2218_v32 }
 0x830   :  { %v2104_v12 = vpop.f32.mrb[34].mxu0 }
 0x831   :  { %v2650_v27 = vpop.f32.mrb[35].mxu0  ;;  %v2105_v15 = vadd.f32 %v2104_v12, %v3261_v29 }
 0x837   :  { %v2881_v39 = vpop.eup %2880 }
 0x838   :  { %v2112_v31 = vadd.f32 1.0, %v2881_v39  ;;  %v2883_v38 = vpop.eup %2882 }
 0x839   :  { %v2119_v13 = vadd.f32 1.0, %v2883_v38 }
 0x83a   :  { %2884 = vrcp.f32 %v2112_v31 }
 0x83b   :  { %2886 = vrcp.f32 %v2119_v13 }
 0x844   :  { %v2885_v17 = vpop.eup %2884 }
 0x845   :  { %v2122_v5 = vmul.f32 %v2885_v17, %v2105_v15  ;;  %v2887_v18 = vpop.eup %2886 }
 0x846   :  { %v2125_v19 = vsub.f32 1.0, %v2887_v18  ;;  %v2127_v23 = vmul.f32 %v2887_v18, %v1894_v63 }
 0x847   :  { %v2123_v10 = vadd.f32 %v2122_v5, %v3263_v36 }
 0x849   :  { %2888 = vtanh.f32 %v2123_v10 }
 0x853   :  { %v2889_v21 = vpop.eup %2888 }
 0x854   :  { %v2126_v43 = vmul.f32 %v2889_v21, %v2125_v19 }
 0x856   :  { %v2128_v24 = vadd.f32 %v2127_v23, %v2126_v43 }
 0x858   :  { %v2130_v26 = vrot.slane %v2128_v24, 2 }
 0x85a   :  { %v2132_v47 = vmul.f32 %v2130_v26, %v2128_v24 }
 0x85c   :  { %v2134_v30 = vsel %vm2133_vm2, %v2132_v47, 0.0 }
 0x85d   :  { %2135 = vadd.xlane.f32.xlu0 %v2134_v30 }
 0x8ea   :  { %v2136_v29 = vpop.xlane.xlu0 %2135 }
 0x8eb   :  { %2138 = vst.msk [vmem:[#allocation8] sm:$0x1] %vm2137_vm3, %v2136_v29 }
 0x8ec   :  { %2967 = shalt.err (!%p2964_p0)
}
 0x8ed   :  { %s2968_s19 = scalar_lea.hbm %s3456_s11, 16 }
 0x8ee   :  { %p2969_p1 = scmp.ne.s32.totalorder %s3456_s11, %s2968_s19  ;;  %p2972_p2 = scmp.lt.u32.totalorder %s2968_s19, %s3456_s11 }
 0x8f0   :  { %p2974_p3 = pnand %p2972_p2, %p2969_p1 }
 0x8f2   :  { %2977 = shalt.err (!%p2974_p3)
}
 0x8f3   :  { %2148 = dma.vmem_to_hbm [thread:$0]  %s2146_s15, 16, %s3456_s11, [#allocation4]  }
 0x8f4   :  { %2982 = dma.done.wait [#allocation4], 16  }
 0x8f5   :  { %2983 = vsyncadd [#allocation4], 4294967280 }
 0x8f6   :  { %2152 = vsyncpa [#allocation3], 1 }
 0x8f7   :  { %2153 = vsyncpa [#allocation6], 1 }
 0x8f8   :  { %2154 = vsyncpa [#allocation4], 1 }

</bundles_post_ra>
